<compile_context>
chip_gen: v7x
topology: tpu7x:2x2x1
jax: 0.10.0
libtpu: 0.0.40
codegen_flags: <defaults>
</compile_context>

<pallas_src>
import functools

import jax
import jax.numpy as jnp
from jax.experimental import pallas as pl
from jax.experimental.pallas import tpu as pltpu

_MIB = 1024 * 1024
_ROW_ALIGN = 32      # covers f32 (8), bf16 (16), int8/fp8 (32) sublane packing
_H_ROW = 0           # lhs row holding w_n  -> h  = <w_n, d>
_SS_ROW = 1          # lhs row holding ones -> ss = <1, d*d> = ||d||^2


def _round_up(x, m):
    return ((x + m - 1) // m) * m


def _round_down(x, m):
    return (x // m) * m


def _lssl_kernel(lhs_ref, z1_ref, z2_ref, o_ref, *, margin):
    # (bm, D) difference in f32 (inputs may be lower precision in HBM).
    d = z1_ref[...].astype(jnp.float32) - z2_ref[...].astype(jnp.float32)
    lhs = lhs_ref[...]                                   # (8, D): [w_n; ones; zeros...]

    # Contract the feature axis of both operands (einsum 'kd,bd->kb') so the
    # per-row reductions come out lane-dense as rows of an (8, bm) result —
    # no (bm, 1) column relayout and no masked 1-lane stores.  The MXU is idle
    # in this mem-bound kernel, so the matmuls are free filler.
    contract_last = (((1,), (1,)), ((), ()))
    hw = jax.lax.dot_general(lhs, d, contract_last,
                             preferred_element_type=jnp.float32)      # (8, bm)
    sq = jax.lax.dot_general(lhs, d * d, contract_last,
                             preferred_element_type=jnp.float32)      # (8, bm)

    h = hw[_H_ROW:_H_ROW + 1, :]                         # (1, bm) = h1 - h2
    zn = jnp.sqrt(sq[_SS_ROW:_SS_ROW + 1, :])            # (1, bm) = ||z1 - z2||
    o_ref[...] = (1.0 + (h + jnp.float32(margin)) / (zn + 1e-7)).astype(o_ref.dtype)


def lssl_loss(z1, z2, weights, *, margin=0.0, rows_per_tile=None):
    """z1, z2: (B, z_dim); weights: any shape holding z_dim elements, e.g. (1,1,z_dim)."""
    B, D = z1.shape
    assert z2.shape == (B, D), "z1 and z2 must have the same shape"
    itemsize = jnp.dtype(z1.dtype).itemsize

    # Forward-pass weight normalization, hoisted out of the per-grid-step body.
    # TODO(synk): the PyTorch module also mutates self.weights.data in place every
    # forward; here the (re-)normalization is purely functional.
    w = weights.reshape(1, D).astype(jnp.float32)
    w_n = w / (jnp.sqrt(jnp.sum(w * w)) + 1e-10)
    # (8, D) matmul LHS: row 0 = normalized weights, row 1 = ones, rest zeros.
    lhs = jnp.concatenate(
        [w_n, jnp.ones((1, D), jnp.float32), jnp.zeros((6, D), jnp.float32)], axis=0)

    # ---- per-generation VMEM budget ------------------------------------------
    try:
        vmem_cap = int(pltpu.get_tpu_info().vmem_capacity_bytes)
    except Exception:
        vmem_cap = 64 * _MIB                       # conservative (v7x-sized) fallback
    if vmem_cap >= 96 * _MIB:                      # v5e / v6e class (128 MiB VMEM)
        target_stream_bytes = 8 * _MIB
        vmem_ceiling = 96 * _MIB
    else:                                          # v7x class (64 MiB VMEM)
        target_stream_bytes = 4 * _MIB
        vmem_ceiling = 48 * _MIB

    # ---- row-tile selection (bytes-driven, not a fixed row count) ------------
    row_bytes = D * itemsize
    if rows_per_tile is None:
        bm = max(_ROW_ALIGN, _round_down(target_stream_bytes // row_bytes, _ROW_ALIGN))
        # VMEM safety cap: 2 streams x 2 pipeline buffers + ~2 f32 temporaries/row.
        per_row_vmem = 4 * D * itemsize + 8 * D
        bm = min(bm, max(_ROW_ALIGN,
                         _round_down(int(0.7 * vmem_ceiling) // per_row_vmem, _ROW_ALIGN)))
        # Keep the grid >= 4 steps (pipelining + v7x megacore) unless the problem is tiny.
        if B * row_bytes > _MIB:
            bm = min(bm, max(_ROW_ALIGN, _round_up(pl.cdiv(B, 4), _ROW_ALIGN)))
        if bm >= B:
            bm = B                                 # single full-extent tile
    else:
        bm = min(int(rows_per_tile), B)
        assert bm == B or bm % _ROW_ALIGN == 0, "rows_per_tile must be 32-aligned"

    nt = pl.cdiv(B, bm)                            # number of row tiles == grid size

    est_vmem = (4 * bm * D * itemsize              # z1/z2 tiles, double-buffered
                + 2 * bm * D * 4                   # f32 temporaries (d, d*d)
                + 4 * 8 * bm * 4                   # (8, bm) matmul results + out tiles
                + 2 * 8 * D * 4                    # lhs (double-buffered)
                + 2 * _MIB)                        # slack
    vmem_limit = int(min(max(est_vmem, 32 * _MIB), vmem_ceiling))

    cost = pl.CostEstimate(
        flops=35 * B * D + 8 * B,                  # two (8 x D x bm) matmuls + elementwise
        transcendentals=B,                         # one sqrt per row
        bytes_accessed=2 * B * D * itemsize + B * 4 + 8 * D * 4,
    )

    kernel = functools.partial(_lssl_kernel, margin=float(margin))
    out = pl.pallas_call(
        kernel,
        out_shape=jax.ShapeDtypeStruct((nt, bm), jnp.float32),
        grid_spec=pltpu.PrefetchScalarGridSpec(
            num_scalar_prefetch=0,
            grid=(nt,),
            in_specs=[
                pl.BlockSpec((8, D), lambda i: (0, 0)),     # [w_n; ones] — stays resident
                pl.BlockSpec((bm, D), lambda i: (i, 0)),    # z1 row tile
                pl.BlockSpec((bm, D), lambda i: (i, 0)),    # z2 row tile
            ],
            out_specs=pl.BlockSpec((1, bm), lambda i: (i, 0)),  # lane-dense result row
        ),
        compiler_params=pltpu.CompilerParams(
            dimension_semantics=("parallel",),     # rows independent -> megacore OK
            vmem_limit_bytes=vmem_limit,
        ),
        cost_estimate=cost,
    )(lhs, z1, z2)
    return out.reshape(-1)[:B]                     # drop tail padding of the last tile


if __name__ == "__main__":
    def reference(z1, z2, weights, margin):
        # Pure-JAX mirror of the PyTorch forward.
        wv = weights.reshape(-1).astype(jnp.float32)
        wv = wv / (jnp.linalg.norm(wv) + 1e-10)
        d = z1.astype(jnp.float32) - z2.astype(jnp.float32)
        zn = jnp.linalg.norm(d, axis=1)
        return 1.0 + ((d @ wv) + margin) / (zn + 1e-7)

    key = jax.random.PRNGKey(0)

    # --- case 1: module-sized smoke test (batch=8, z_dim=32), single tile -----
    z_dim, batch, margin = 32, 8, 0.0
    kw, k1, k2, key = jax.random.split(key, 4)
    weights = jax.random.normal(kw, (1, 1, z_dim), dtype=jnp.float32)
    weights = weights / (jnp.linalg.norm(weights) + 1e-10)     # as in __init__
    z1 = jax.random.normal(k1, (batch, z_dim), dtype=jnp.float32)
    z2 = jax.random.normal(k2, (batch, z_dim), dtype=jnp.float32)
    out = jax.block_until_ready(lssl_loss(z1, z2, weights, margin=margin))
    ref = reference(z1, z2, weights, margin)
    assert out.shape == (batch,), out.shape
    # MXU f32 matmul passes can differ slightly from the plain-JAX reference path.
    assert jnp.allclose(out, ref, rtol=5e-3, atol=5e-3), (out, ref)

    # --- case 2: multi-tile grid with a ragged tail (B not a multiple of bm) ---
    z_dim, batch, margin = 256, 200, 0.25
    kw, k1, k2, key = jax.random.split(key, 4)
    weights = jax.random.normal(kw, (1, 1, z_dim), dtype=jnp.float32)
    z1 = jax.random.normal(k1, (batch, z_dim), dtype=jnp.float32)
    z2 = jax.random.normal(k2, (batch, z_dim), dtype=jnp.float32)
    out = jax.block_until_ready(
        lssl_loss(z1, z2, weights, margin=margin, rows_per_tile=64))
    ref = reference(z1, z2, weights, margin)
    assert out.shape == (batch,), out.shape
    assert jnp.allclose(out, ref, rtol=5e-3, atol=5e-3), (out, ref)

    print("KERNEL_OK")
</pallas_src>

<mosaic_0001>
module attributes {stable_mosaic.version = 11 : i64} {
  func.func @_lssl_kernel(%arg0: i32, %arg1: memref<8x32xf32, #tpu.memory_space<vmem>>, %arg2: memref<8x32xf32, #tpu.memory_space<vmem>>, %arg3: memref<8x32xf32, #tpu.memory_space<vmem>>, %arg4: memref<1x8xf32, #tpu.memory_space<vmem>>) attributes {dimension_semantics = [#tpu.dimension_semantics<parallel>], iteration_bounds = array<i64: 1>, scalar_prefetch = 0 : i64, scratch_operands = 0 : i64, tpu.core_type = #tpu.core_type<tc>, window_params = [{pipeline_mode = #tpu.pipeline_mode<synchronous>, transform_indices = @transform_0, window_bounds = array<i64: 8, 32>}, {transform_indices = @transform_1, window_bounds = array<i64: 8, 32>}, {transform_indices = @transform_2, window_bounds = array<i64: 8, 32>}, {transform_indices = @transform_3, window_bounds = array<i64: 1, 8>}]} {
    %c0 = arith.constant 0 : index
    %c0_0 = arith.constant 0 : index
    %0 = vector.load %arg2[%c0, %c0_0] : memref<8x32xf32, #tpu.memory_space<vmem>>, vector<8x32xf32>
    %c0_1 = arith.constant 0 : index
    %c0_2 = arith.constant 0 : index
    %1 = vector.load %arg3[%c0_1, %c0_2] : memref<8x32xf32, #tpu.memory_space<vmem>>, vector<8x32xf32>
    %2 = arith.subf %0, %1 : vector<8x32xf32>
    %c0_3 = arith.constant 0 : index
    %c0_4 = arith.constant 0 : index
    %3 = vector.load %arg1[%c0_3, %c0_4] : memref<8x32xf32, #tpu.memory_space<vmem>>, vector<8x32xf32>
    %cst = arith.constant dense<0.000000e+00> : vector<8x8xf32>
    %4 = tpu.matmul %3, %2, %cst {dimension_numbers = #tpu.dot_dimension_numbers<[1], [1], [0], [0], [0, 0, 1, 0], [], []>} : vector<8x32xf32>, vector<8x32xf32>, vector<8x8xf32> -> vector<8x8xf32>
    %5 = arith.mulf %2, %2 : vector<8x32xf32>
    %cst_5 = arith.constant dense<0.000000e+00> : vector<8x8xf32>
    %6 = tpu.matmul %3, %5, %cst_5 {dimension_numbers = #tpu.dot_dimension_numbers<[1], [1], [0], [0], [0, 0, 1, 0], [], []>} : vector<8x32xf32>, vector<8x32xf32>, vector<8x8xf32> -> vector<8x8xf32>
    %7 = vector.extract_strided_slice %4 {offsets = [0, 0], sizes = [1, 8], strides = [1, 1]} : vector<8x8xf32> to vector<1x8xf32>
    %8 = vector.extract_strided_slice %6 {offsets = [1, 0], sizes = [1, 8], strides = [1, 1]} : vector<8x8xf32> to vector<1x8xf32>
    %9 = math.sqrt %8 : vector<1x8xf32>
    %cst_6 = arith.constant 0.000000e+00 : f32
    %10 = vector.broadcast %cst_6 : f32 to vector<1x8xf32>
    %11 = arith.addf %7, %10 : vector<1x8xf32>
    %cst_7 = arith.constant 1.000000e-07 : f32
    %12 = vector.broadcast %cst_7 : f32 to vector<1x8xf32>
    %13 = arith.addf %9, %12 : vector<1x8xf32>
    %14 = arith.divf %11, %13 : vector<1x8xf32>
    %cst_8 = arith.constant 1.000000e+00 : f32
    %15 = vector.broadcast %cst_8 : f32 to vector<1x8xf32>
    %16 = arith.addf %15, %14 : vector<1x8xf32>
    %c0_9 = arith.constant 0 : index
    %c0_10 = arith.constant 0 : index
    %17 = vector.load %arg4[%c0_9, %c0_10] : memref<1x8xf32, #tpu.memory_space<vmem>>, vector<1x8xf32>
    tpu.vector_store %arg4[%c0_9, %c0_10], %16 {strides = array<i32>} : memref<1x8xf32, #tpu.memory_space<vmem>>, vector<1x8xf32>,
    return
  }
  func.func @transform_0(%arg0: i32) -> (i32, i32) {
    %c0_i32 = arith.constant 0 : i32
    %c0_i32_0 = arith.constant 0 : i32
    %c0_i32_1 = arith.constant 0 : i32
    return %c0_i32, %c0_i32_0 : i32, i32
  }
  func.func @transform_1(%arg0: i32) -> (i32, i32) {
    %c0_i32 = arith.constant 0 : i32
    %c0_i32_0 = arith.constant 0 : i32
    return %arg0, %c0_i32 : i32, i32
  }
  func.func @transform_2(%arg0: i32) -> (i32, i32) {
    %c0_i32 = arith.constant 0 : i32
    %c0_i32_0 = arith.constant 0 : i32
    return %arg0, %c0_i32 : i32, i32
  }
  func.func @transform_3(%arg0: i32) -> (i32, i32) {
    %c0_i32 = arith.constant 0 : i32
    %c0_i32_0 = arith.constant 0 : i32
    return %arg0, %c0_i32 : i32, i32
  }
}

</mosaic_0001>

<bundles_post_ra>
// kernel: tpu_custom_call.1
= control target key start
LH: loop header
LB: loop body
LE: loop exit
PB: predicated region body
PF: predicated region fallthrough
CT: control target
= control target key end

     0   :  { %8 = vsyncpa [#allocation3], 0  ;;  %s434_s0 = inlined_call_operand.hbm [shape: f32[8,32], index: 0, kind: input, shape index: {}]   ;;  %s435_s1 = inlined_call_operand.hbm [shape: f32[8,32], index: 1, kind: input, shape index: {}]   ;;  %s436_s2 = inlined_call_operand.hbm [shape: f32[8,32], index: 2, kind: input, shape index: {}]   ;;  %s437_s3 = inlined_call_operand.hbm [shape: f32[1,8], index: 3, kind: output, shape index: {}]  }
   0x1   :  { %9 = vsyncpa [#allocation6], 0 }
   0x2   :  { %10 = vsyncpa [#allocation4], 0  ;;  %s360_s12 = smov [#allocation5]   ;;  %s361_s14 = smov [#allocation2]  }
   0x3   :  { %s27_s13 = sshll.u32 %s360_s12, 4  ;;  %s17_s15 = sshll.u32 %s361_s14, 4  ;;  %s28_s13 = int_to_ptr.vmem [resolvable:$true] %s27_s13  ;;  %s18_s15 = int_to_ptr.vmem [resolvable:$true] %s17_s15 }
   0x4   :  { %s266_s18 = scalar_lea.hbm %s435_s1, 128 }
   0x5   :  { %p267_p0 = scmp.ne.s32.totalorder %s435_s1, %s266_s18  ;;  %p270_p1 = scmp.lt.u32.totalorder %s266_s18, %s435_s1 }
   0x7   :  { %p272_p2 = pnand %p270_p1, %p267_p0 }
   0x9   :  { %275 = shalt.err (!%p272_p2)
}
   0xa   :  { %s276_s23 = scalar_lea.vmem %s28_s13, 128  ;;  %p281_p4 = scmp.lt.s32.totalorder %s28_s13, %s28_s13 }
   0xb   :  { %p277_p3 = scmp.ne.s32.totalorder %s28_s13, %s276_s23  ;;  %p282_p5 = scmp.lt.s32.totalorder %s276_s23, %s276_s23 }
   0xd   :  { %p283_p6 = por %p282_p5, %p281_p4 }
   0xf   :  { %p284_p7 = pnand %p283_p6, %p277_p3 }
  0x11   :  { %287 = shalt.err (!%p284_p7)
}
  0x12   :  { %30 = dma.hbm_to_vmem [thread:$0]  %s435_s1, 128, %s28_s13, [#allocation6]  }
  0x13   :  { %s288_s28 = scalar_lea.hbm %s434_s0, 128 }
  0x14   :  { %p289_p8 = scmp.ne.s32.totalorder %s434_s0, %s288_s28  ;;  %p292_p9 = scmp.lt.u32.totalorder %s288_s28, %s434_s0 }
  0x16   :  { %p294_p10 = pnand %p292_p9, %p289_p8 }
  0x18   :  { %297 = shalt.err (!%p294_p10)
}
  0x19   :  { %s298_s6 = scalar_lea.vmem %s18_s15, 128  ;;  %p303_p12 = scmp.lt.s32.totalorder %s18_s15, %s18_s15 }
  0x1a   :  { %p299_p11 = scmp.ne.s32.totalorder %s18_s15, %s298_s6  ;;  %p304_p13 = scmp.lt.s32.totalorder %s298_s6, %s298_s6 }
  0x1c   :  { %p305_p0 = por %p304_p13, %p303_p12 }
  0x1e   :  { %p306_p1 = pnand %p305_p0, %p299_p11 }
  0x20   :  { %309 = shalt.err (!%p306_p1)
}
  0x21   :  { %20 = dma.hbm_to_vmem [thread:$0]  %s434_s0, 128, %s18_s15, [#allocation3]  }
  0x22   :  { %s362_s8 = smov [#allocation7]   ;;  %s310_s12 = scalar_lea.hbm %s436_s2, 128 }
  0x23   :  { %s37_s9 = sshll.u32 %s362_s8, 4  ;;  %p311_p2 = scmp.ne.s32.totalorder %s436_s2, %s310_s12  ;;  %s38_s9 = int_to_ptr.vmem [resolvable:$true] %s37_s9 }
  0x24   :  { %p314_p3 = scmp.lt.u32.totalorder %s310_s12, %s436_s2 }
  0x26   :  { %p316_p4 = pnand %p314_p3, %p311_p2 }
  0x28   :  { %319 = shalt.err (!%p316_p4)
}
  0x29   :  { %s320_s18 = scalar_lea.vmem %s38_s9, 128  ;;  %p325_p6 = scmp.lt.s32.totalorder %s38_s9, %s38_s9 }
  0x2a   :  { %p321_p5 = scmp.ne.s32.totalorder %s38_s9, %s320_s18  ;;  %p326_p7 = scmp.lt.s32.totalorder %s320_s18, %s320_s18 }
  0x2c   :  { %p327_p8 = por %p326_p7, %p325_p6 }
  0x2e   :  { %p328_p9 = pnand %p327_p8, %p321_p5 }
  0x30   :  { %331 = shalt.err (!%p328_p9)
}
  0x31   :  { %40 = dma.hbm_to_vmem [thread:$0]  %s436_s2, 128, %s38_s9, [#allocation6]  }
  0x32   :  { %354 = dma.done.wait [#allocation3], 128  }
  0x33   :  { %355 = vsyncadd [#allocation3], 4294967168 }
  0x34   :  { %356 = dma.done.wait [#allocation6], 256  }
  0x35   :  { %357 = vsyncadd [#allocation6], 4294967040  ;;  %v363_v0 = vmov 0.0   ;;  %vm364_vm0 = vmmov 0   ;;  %v50_v1 = vld [vmem:[#allocation5] sm:$0xff]  ;;  %v51_v2 = vld [vmem:[#allocation7] sm:$0xff] }
  0x36   :  { %251 = vmatprep.subr.mxu1 %v363_v0  ;;  %253 = vmatprep.mubr.msk.f32.mxu1 %vm364_vm0, %v363_v0  ;;  %v52_v3 = vsub.f32 %v50_v1, %v51_v2  ;;  %vm54_vm1 = vcmask 261120   ;;  %v53_v5 = vld [vmem:[#allocation2] sm:$0xff]  ;;  %s365_s2 = smov [#allocation8]   ;;  %vm220_vm4 = vcmask 57344  }
  0x37   :  { %246 = vmatprep.subr.mxu0 %v363_v0  ;;  %248 = vmatprep.mubr.msk.f32.mxu0 %vm364_vm0, %v363_v0  ;;  %s228_s19 = sshll.u32 %s365_s2, 4  ;;  %s229_s19 = int_to_ptr.vmem [resolvable:$true] %s228_s19 }
  0x38   :  { %v131_v4 = vmul.f32 %v52_v3, %v52_v3  ;;  %247 = vmatpush3.xpose.msk.msra.mxu0 %vm54_vm1, %v52_v3  ;;  %s332_s20 = scalar_lea.vmem %s229_s19, 16  ;;  %s336_s21 = scalar_lea.vmem %s229_s19, 32 }
  0x39   :  { %p333_p10 = scmp.ne.s32.totalorder %s229_s19, %s332_s20  ;;  %p337_p11 = scmp.lt.s32.totalorder %s229_s19, %s229_s19 }
  0x3a   :  { %252 = vmatpush3.xpose.msk.msra.mxu1 %vm54_vm1, %v131_v4  ;;  %p338_p12 = scmp.lt.s32.totalorder %s336_s21, %s332_s20 }
  0x3b   :  { %249 = vmatmul.mubr.msk.f32.vlgmr.msra.gmra.mrb[0].mxu0 %vm54_vm1, %v53_v5 }
  0x3c   :  { %p339_p13 = por %p338_p12, %p337_p11 }
  0x3d   :  { %254 = vmatmul.mubr.msk.f32.vlgmr.msra.gmra.mrb[0].mxu1 %vm54_vm1, %v53_v5 }
  0x3e   :  { %p340_p0 = pnand %p339_p13, %p333_p10 }
 0x10e   :  { %v127_v6 = vpop.f32.mrb[0].mxu0 }
 0x10f   :  { %v250_v7 = vpop.f32.mrb[1].mxu0 }
 0x110   :  { %v201_v8 = vpop.f32.mrb[0].mxu1 }
 0x111   :  { %262 = vrsqrt.f32 %v201_v8  ;;  %v255_v9 = vpop.f32.mrb[1].mxu1  ;;  %vm207_vm2 = vcmp.eq.f32.partialorder %v201_v8, inf  ;;  %v210_v12 = vand.u32 2147483648, %v201_v8  ;;  %vm209_vm3 = vcmp.eq.f32.partialorder %v201_v8, 0.0 }
 0x11b   :  { %v263_v10 = vpop.eup %262 }
 0x11c   :  { %v206_v11 = vmul.f32 %v263_v10, %v201_v8 }
 0x11e   :  { %v208_v13 = vsel %vm207_vm2, %v201_v8, %v206_v11 }
 0x11f   :  { %v211_v14 = vsel %vm209_vm3, %v210_v12, %v208_v13 }
 0x120   :  { %v213_v15 = vadd.f32 1e-07, %v211_v14 }
 0x122   :  { %v215_v16 = vrot.slane %v213_v15, 1 }
 0x124   :  { %264 = vrcp.f32 %v215_v16 }
 0x12e   :  { %v265_v17 = vpop.eup %264 }
 0x12f   :  { %v218_v18 = vmul.f32 %v265_v17, %v127_v6 }
 0x131   :  { %v219_v19 = vadd.f32 1.0, %v218_v18 }
 0x133   :  { %221 = vst.msk [vmem:[#allocation8] sm:$0x1] %vm220_vm4, %v219_v19 }
 0x134   :  { %343 = shalt.err (!%p340_p0)
}
 0x135   :  { %s344_s24 = scalar_lea.hbm %s437_s3, 16 }
 0x136   :  { %p345_p1 = scmp.ne.s32.totalorder %s437_s3, %s344_s24  ;;  %p348_p2 = scmp.lt.u32.totalorder %s344_s24, %s437_s3 }
 0x138   :  { %p350_p3 = pnand %p348_p2, %p345_p1 }
 0x13a   :  { %353 = shalt.err (!%p350_p3)
}
 0x13b   :  { %231 = dma.vmem_to_hbm [thread:$0]  %s229_s19, 16, %s437_s3, [#allocation4]  }
 0x13c   :  { %358 = dma.done.wait [#allocation4], 16  }
 0x13d   :  { %359 = vsyncadd [#allocation4], 4294967280 }
 0x13e   :  { %235 = vsyncpa [#allocation3], 1 }
 0x13f   :  { %236 = vsyncpa [#allocation6], 1 }
 0x140   :  { %237 = vsyncpa [#allocation4], 1 }

</bundles_post_ra>
